<compile_context>
chip_gen: v6e
topology: v6e:2x2x1
jax: 0.10.0
libtpu: 0.0.40
codegen_flags: <defaults>
</compile_context>

<pallas_src>
import jax
import jax.numpy as jnp
from jax.experimental import pallas as pl
from jax.experimental.pallas import tpu as pltpu


def _ca_kernel(x_ref, w1t_ref, w2t_ref, o_ref):
    # x_ref  : (TB, C, HW)  current batch tile
    # w1t_ref: (C, Cr)      first Linear weight, pre-transposed (in_feat x out_feat)
    # w2t_ref: (Cr, C)      second Linear weight, pre-transposed
    # o_ref  : (TB, C, HW)
    x = x_ref[...]                                           # native dtype (bf16/f32)
    hw = x.shape[-1]

    # Global average pool: f32 accumulation over the lane axis, then one tiny
    # scale by the compile-time constant 1/HW applied to the (TB, C) result.
    pooled = jnp.sum(x.astype(jnp.float32), axis=-1) * jnp.float32(1.0 / hw)  # (TB, C)

    # Batched bottleneck MLP on the MXU (f32 throughout the tiny path).
    w1t = w1t_ref[...].astype(jnp.float32)                   # (C, Cr)
    w2t = w2t_ref[...].astype(jnp.float32)                   # (Cr, C)
    hidden = jnp.maximum(
        jnp.dot(pooled, w1t, preferred_element_type=jnp.float32), 0.0)        # (TB, Cr)
    scale = jax.nn.sigmoid(
        jnp.dot(hidden, w2t, preferred_element_type=jnp.float32))             # (TB, C)

    # Channel-wise rescale in the input dtype, broadcast over the lane axis.
    o_ref[...] = x * scale.astype(x.dtype)[:, :, None]


def _choose_batch_tile(B, C, HW, itemsize, vmem_budget_bytes=12 * 1024 * 1024):
    """Largest divisor of B whose double-buffered in+out blocks fit the budget,
    preferring choices that leave >= 2 grid steps (pipelining / v7x dual-TC)."""
    per_elem = 4 * C * HW * itemsize            # 2 buffers x (in + out) per batch element
    cap = max(1, vmem_budget_bytes // per_elem)
    divisors = [d for d in range(1, B + 1) if B % d == 0 and d <= cap]
    if not divisors:
        divisors = [1]
    multi_step = [d for d in divisors if B // d >= 2]
    return max(multi_step) if multi_step else max(divisors)


def ca_layer(x, w1, w2):
    """x: (B, C, H, W) NCHW; w1: (C//r, C); w2: (C, C//r). Returns (B, C, H, W)."""
    B, C, H, W = x.shape
    HW = H * W
    Cr = w1.shape[0]
    x_flat = x.reshape(B, C, HW)

    # Pre-transpose the tiny weights once on the host (negligible cost) so the
    # in-kernel matmuls are plain row-major (TB,C)@(C,Cr) / (TB,Cr)@(Cr,C).
    w1t = jnp.transpose(w1)                     # (C, Cr)
    w2t = jnp.transpose(w2)                     # (Cr, C)

    tb = _choose_batch_tile(B, C, HW, x.dtype.itemsize)
    # TODO(synk): for very large HW (single batch element > VMEM budget) add an
    # HW-tiled two-pass variant (pool+MLP pass, then tiled rescale pass).

    out = pl.pallas_call(
        _ca_kernel,
        out_shape=jax.ShapeDtypeStruct((B, C, HW), x.dtype),
        grid_spec=pltpu.PrefetchScalarGridSpec(
            num_scalar_prefetch=0,
            grid=(B // tb,),
            in_specs=[
                pl.BlockSpec((tb, C, HW), lambda b: (b, 0, 0)),
                pl.BlockSpec((C, Cr), lambda b: (0, 0)),
                pl.BlockSpec((Cr, C), lambda b: (0, 0)),
            ],
            out_specs=pl.BlockSpec((tb, C, HW), lambda b: (b, 0, 0)),
        ),
        compiler_params=pltpu.CompilerParams(
            dimension_semantics=("parallel",)),
    )(x_flat, w1t, w2t)

    return out.reshape(B, C, H, W)


def ca_layer_ref(x, w1, w2):
    """Pure-JAX reference matching the PyTorch forward."""
    pooled = jnp.mean(x.astype(jnp.float32), axis=(2, 3))         # (B, C)
    h = jnp.maximum(pooled @ w1.T.astype(jnp.float32), 0.0)       # (B, Cr)
    s = jax.nn.sigmoid(h @ w2.T.astype(jnp.float32))              # (B, C)
    return (x.astype(jnp.float32) * s[:, :, None, None]).astype(x.dtype)


if __name__ == "__main__":
    # Small shapes consistent with the module: in_channels=32, reduction=4.
    B, C, H, W = 2, 32, 16, 16
    reduction = 4
    Cr = C // reduction

    key = jax.random.PRNGKey(0)
    kx, k1, k2 = jax.random.split(key, 3)
    x = jax.random.normal(kx, (B, C, H, W), dtype=jnp.float32)
    # PyTorch Linear layout: (out_features, in_features), no bias.
    w1 = jax.random.normal(k1, (Cr, C), dtype=jnp.float32) * 0.1
    w2 = jax.random.normal(k2, (C, Cr), dtype=jnp.float32) * 0.1

    out = jax.block_until_ready(ca_layer(x, w1, w2))
    ref = jax.block_until_ready(ca_layer_ref(x, w1, w2))

    assert out.shape == (B, C, H, W)
    assert jnp.allclose(out, ref, atol=1e-5, rtol=1e-5), "mismatch vs reference"
    print("KERNEL_OK")
</pallas_src>

<mosaic_0001>
module attributes {stable_mosaic.version = 11 : i64} {
  func.func @_ca_kernel(%arg0: i32, %arg1: memref<1x32x256xf32, #tpu.memory_space<vmem>>, %arg2: memref<32x8xf32, #tpu.memory_space<vmem>>, %arg3: memref<8x32xf32, #tpu.memory_space<vmem>>, %arg4: memref<1x32x256xf32, #tpu.memory_space<vmem>>) attributes {dimension_semantics = [#tpu.dimension_semantics<parallel>], iteration_bounds = array<i64: 2>, scalar_prefetch = 0 : i64, scratch_operands = 0 : i64, tpu.core_type = #tpu.core_type<tc>, window_params = [{transform_indices = @transform_0, window_bounds = array<i64: 1, 32, 256>}, {pipeline_mode = #tpu.pipeline_mode<synchronous>, transform_indices = @transform_1, window_bounds = array<i64: 32, 8>}, {pipeline_mode = #tpu.pipeline_mode<synchronous>, transform_indices = @transform_2, window_bounds = array<i64: 8, 32>}, {transform_indices = @transform_3, window_bounds = array<i64: 1, 32, 256>}]} {
    %c0 = arith.constant 0 : index
    %c0_0 = arith.constant 0 : index
    %c0_1 = arith.constant 0 : index
    %0 = vector.load %arg1[%c0, %c0_0, %c0_1] : memref<1x32x256xf32, #tpu.memory_space<vmem>>, vector<1x32x256xf32>
    %cst = arith.constant dense<0.000000e+00> : vector<1x32xf32>
    %1 = vector.multi_reduction <add>, %0, %cst [2] : vector<1x32x256xf32> to vector<1x32xf32>
    %cst_2 = arith.constant 3.906250e-03 : f32
    %2 = vector.broadcast %cst_2 : f32 to vector<1x32xf32>
    %3 = arith.mulf %1, %2 : vector<1x32xf32>
    %c0_3 = arith.constant 0 : index
    %c0_4 = arith.constant 0 : index
    %4 = vector.load %arg2[%c0_3, %c0_4] : memref<32x8xf32, #tpu.memory_space<vmem>>, vector<32x8xf32>
    %c0_5 = arith.constant 0 : index
    %c0_6 = arith.constant 0 : index
    %5 = vector.load %arg3[%c0_5, %c0_6] : memref<8x32xf32, #tpu.memory_space<vmem>>, vector<8x32xf32>
    %cst_7 = arith.constant dense<0.000000e+00> : vector<1x8xf32>
    %6 = tpu.matmul %3, %4, %cst_7 {dimension_numbers = #tpu.dot_dimension_numbers<[1], [0], [0], [1], [0, 0, 1, 1], [], []>} : vector<1x32xf32>, vector<32x8xf32>, vector<1x8xf32> -> vector<1x8xf32>
    %cst_8 = arith.constant 0.000000e+00 : f32
    %7 = vector.broadcast %cst_8 : f32 to vector<1x8xf32>
    %8 = arith.maximumf %6, %7 : vector<1x8xf32>
    %cst_9 = arith.constant dense<0.000000e+00> : vector<1x32xf32>
    %9 = tpu.matmul %8, %5, %cst_9 {dimension_numbers = #tpu.dot_dimension_numbers<[1], [0], [0], [1], [0, 0, 1, 1], [], []>} : vector<1x8xf32>, vector<8x32xf32>, vector<1x32xf32> -> vector<1x32xf32>
    %10 = arith.negf %9 : vector<1x32xf32>
    %11 = math.exp %10 : vector<1x32xf32>
    %cst_10 = arith.constant 1.000000e+00 : f32
    %12 = vector.broadcast %cst_10 : f32 to vector<1x32xf32>
    %13 = arith.addf %12, %11 : vector<1x32xf32>
    %14 = arith.divf %12, %13 : vector<1x32xf32>
    %15 = vector.shape_cast %14 : vector<1x32xf32> to vector<1x32x1xf32>
    %16 = vector.broadcast %15 : vector<1x32x1xf32> to vector<1x32x256xf32>
    %17 = arith.mulf %0, %16 : vector<1x32x256xf32>
    %c0_11 = arith.constant 0 : index
    %c0_12 = arith.constant 0 : index
    %c0_13 = arith.constant 0 : index
    %18 = vector.load %arg4[%c0_11, %c0_12, %c0_13] : memref<1x32x256xf32, #tpu.memory_space<vmem>>, vector<1x32x256xf32>
    tpu.vector_store %arg4[%c0_11, %c0_12, %c0_13], %17 {strides = array<i32>} : memref<1x32x256xf32, #tpu.memory_space<vmem>>, vector<1x32x256xf32>,
    return
  }
  func.func @transform_0(%arg0: i32) -> (i32, i32, i32) {
    %c0_i32 = arith.constant 0 : i32
    %c0_i32_0 = arith.constant 0 : i32
    %c0_i32_1 = arith.constant 0 : i32
    return %arg0, %c0_i32, %c0_i32_0 : i32, i32, i32
  }
  func.func @transform_1(%arg0: i32) -> (i32, i32) {
    %c0_i32 = arith.constant 0 : i32
    %c0_i32_0 = arith.constant 0 : i32
    %c0_i32_1 = arith.constant 0 : i32
    return %c0_i32, %c0_i32_0 : i32, i32
  }
  func.func @transform_2(%arg0: i32) -> (i32, i32) {
    %c0_i32 = arith.constant 0 : i32
    %c0_i32_0 = arith.constant 0 : i32
    %c0_i32_1 = arith.constant 0 : i32
    return %c0_i32, %c0_i32_0 : i32, i32
  }
  func.func @transform_3(%arg0: i32) -> (i32, i32, i32) {
    %c0_i32 = arith.constant 0 : i32
    %c0_i32_0 = arith.constant 0 : i32
    %c0_i32_1 = arith.constant 0 : i32
    return %arg0, %c0_i32, %c0_i32_0 : i32, i32, i32
  }
}

</mosaic_0001>

<bundles_post_ra>
// kernel: tpu_custom_call.1
= control target key start
LH: loop header
LB: loop body
LE: loop exit
PB: predicated region body
PF: predicated region fallthrough
CT: control target
= control target key end

     0   :  { %8 = vsyncpa [#allocation3], 0  ;;  %s950_s0 = inlined_call_operand.hbm [shape: f32[2,32,256], index: 0, kind: input, shape index: {}]   ;;  %s951_s1 = inlined_call_operand.vmem [shape: f32[32,8], index: 1, kind: input, shape index: {}]   ;;  %s952_s2 = inlined_call_operand.vmem [shape: f32[8,32], index: 2, kind: input, shape index: {}]   ;;  %s953_s3 = inlined_call_operand.hbm [shape: f32[2,32,256], index: 3, kind: output, shape index: {}]  }
   0x1   :  { %10 = vsyncpa [#allocation3 + $0x1], 0 }
   0x2   :  { %11 = vsyncpa [#allocation4], 0 }
   0x3   :  { %13 = vsyncpa [#allocation4 + $0x1], 0  ;;  %s745_s12 = smov 0   ;;  %s747_s13 = smov 0  }
   0x4   :  { %s749_s14 = smov 0   ;;  %s751_s15 = smov 0  }
   0x5 LB: > { %s766_s16 = sadd.s32 4294967295, %s715_s15   ;;  %s525_s17 = sadd.s32 4294967294, %s715_s15   ;;  %s715_s15 = sphi %s751_s15, %s968_s15   ;;  %s711_s14 = sphi %s749_s14, %s967_s14   ;;  %s707_s13 = sphi %s747_s13, %s966_s13   ;;  %s703_s12 = sphi %s745_s12, %s965_s12  }
   0x6   : > { %s770_s18 = sadd.s32 1, %s715_s15   ;;  %s26_s19 = sadd.s32 1, %s711_s14 }
   0x7   : > { %s23_s20 = ssub.s32 %s715_s15, %s770_s18  ;;  %p33_p0 = scmp.ne.s32.totalorder %s711_s14, %s707_s13 }
   0x8   : > { %p24_p1 = scmp.eq.s32.totalorder %s23_s20, 0  ;;  %p34_p2 = scmp.eq.s32.totalorder %s715_s15, 0 }
   0x9   : > { %p39_p3 = scmp.ne.s32.totalorder %s707_s13, %s703_s12  ;;  %p40_p4 = scmp.eq.s32.totalorder %s766_s16, 0 }
   0xa   : > { %s782_s21 = scalar_select %p24_p1, %s711_s14, %s26_s19  }
   0xb   : > { %p784_p5 = por %p34_p2, %p33_p0  ;;  %p788_p6 = por %p40_p4, %p39_p3 }
   0xc   : > { %p105_p7 = scmp.eq.s32.totalorder %s766_s16, 1  ;;  %p111_p8 = scmp.eq.s32.totalorder %s525_s17, 1 }
   0xd   : > { %s957_s23 = scalar_select %p788_p6, 1, 0 }
   0xe   : > { %p579_p10 = scmp.lt.s32.totalorder %s715_s15, 2  ;;  %p795_p11 = por %p105_p7, %p33_p0 }
   0xf   : > { %p799_p12 = por %p111_p8, %p39_p3  ;;  %s137_s26 = sand.u32 1, %s711_s14  }
  0x10   : > { %s958_s24 = scalar_select %p795_p11, 1, 0 }
  0x11   : > { %s959_s25 = scalar_select %p799_p12, 1, 0 }
  0x12   : > { %s542_s27 = sshll.u32 %s715_s15, 10  ;;  %s528_s28 = sshll.u32 %s137_s26, 6 }
  0x13   : > { %s808_s4 = scalar_lea.hbm %s950_s0, %s542_s27  ;;  %s141_s5 = scalar_lea.vmem [#allocation2], %s528_s28 }
  0x14   : > { %s148_s6 = sshll.u32 %s141_s5, 4  ;;  %p812_p13 = pnand %p579_p10, %p784_p5  ;;  %s816_s6 = int_to_ptr.vmem [resolvable:$true] %s148_s6 }
  0x15   : > { %s818_s8 = scalar_lea.sflag [#allocation3], %s137_s26  ;;  %s623_s9 = scalar_lea.hbm %s808_s4, 1024 }
  0x16   : > { %p624_p0 = scmp.ne.s32.totalorder %s808_s4, %s623_s9  ;;  %p625_p1 = pneg %p812_p13 }
  0x17   : > { %s628_s17 = scalar_lea.hbm %s950_s0, 2048  ;;  %p629_p4 = scmp.lt.s32.totalorder %s808_s4, %s950_s0 }
  0x18   : > { %p626_p2 = pnand %p625_p1, %p624_p0  ;;  %p630_p5 = scmp.lt.s32.totalorder %s628_s17, %s623_s9 }
  0x1a   : > { %p627_p3 = pneg %p626_p2  ;;  %p631_p7 = por %p630_p5, %p629_p4 }
  0x1c   : > { %p632_p8 = pnand %p631_p7, %p627_p3 }
  0x1e   : > { %635 = shalt.err (!%p632_p8)
}
  0x1f   : > { %s636_s22 = scalar_lea.vmem %s816_s6, 1024  ;;  %s717_s26 = smov [#allocation2]  }
  0x20   : > { %p637_p10 = scmp.ne.s32.totalorder %s816_s6, %s636_s22  ;;  %s641_s27 = sshll.u32 %s717_s26, 4  ;;  %s642_s27 = int_to_ptr.vmem [resolvable:$false] %s641_s27 }
  0x21   : > { %s643_s28 = scalar_lea.vmem %s642_s27, 2048  ;;  %p644_p2 = scmp.lt.s32.totalorder %s816_s6, %s642_s27 }
  0x22   : > { %p639_p9 = pnand %p637_p10, %p625_p1  ;;  %p645_p12 = scmp.lt.s32.totalorder %s643_s28, %s636_s22 }
  0x24   : > { %p640_p0 = pneg %p639_p9  ;;  %p646_p11 = por %p645_p12, %p644_p2 }
  0x26   : > { %p647_p6 = pnand %p646_p11, %p640_p0 }
  0x28   : > { %650 = shalt.err (!%p647_p6)
}
  0x29   : > { %s718_s29 = smov 256   ;;  %s719_s30 = smov 16  }
  0x2a   : > { %574 = dma.hbm_to_vmem [thread:$0]  (!%p812_p13), %s808_s4, 1024, %s816_s6, %s818_s8, %s718_s29, %s718_s29, %s719_s30  }
  0x2b   : > { %p531_p9 = scmp.ge.s32.totalorder %s715_s15, 1  ;;  %p156_p1 = scmp.lt.s32.totalorder %s715_s15, 3 }
  0x2d   : > { %p157_p3 = pnand %p531_p9, %p156_p1 }
  0x2e   : > { %s842_s5 = sand.u32 (!%p157_p3), 1, %s707_s13   ;;  %p961_p6 = scmp.ne.s32.totalorder (!%p157_p3), %s957_s23, 0 }
  0x2f   : > { %160 = sbr.rel (%p157_p3) target bundleno = 766 (0x2fe), region = 32  ;;  %s532_s9 = sshll.u32 (!%p157_p3), %s842_s5, 6 }
  0x30   : > { %s163_s10 = scalar_lea.sflag (!%p157_p3), [#allocation3], %s842_s5  ;;  %s166_s11 = scalar_lea.vmem (!%p157_p3), [#allocation2], %s532_s9 }
  0x34   : > { %694 = dma.done.wait (%p961_p6), %s163_s10, 1024  }
  0x35   : > { %696 = vsyncadd (%p961_p6), %s163_s10, 4294966272  ;;  %v852_v0 = vld [vmem:[%s166_s11] sm:$0xff]  ;;  %v854_v1 = vld [vmem:[%s166_s11 + $0x8] sm:$0xff]  ;;  %v720_v12 = vmov 0.0   ;;  %vm721_vm0 = vmmov 0   ;;  %v222_v17 = vlaneseq  ;;  %vm233_vm1 = vcmask 130112  }
  0x36   : > { %v856_v2 = vld [vmem:[%s166_s11 + $0x20] sm:$0xff]  ;;  %v197_v3 = vadd.f32 %v854_v1, %v852_v0  ;;  %v860_v4 = vld [vmem:[%s166_s11 + $0x28] sm:$0xff]  ;;  %v862_v5 = vld [vmem:[%s166_s11 + $0x10] sm:$0xff]  ;;  %551 = vmatprep.subr.mxu0 %v720_v12  ;;  %562 = vmatprep.subr.mxu1 %v720_v12  ;;  %vm240_vm2 = vcmask 195712   ;;  %vm247_vm3 = vcmask 261312   ;;  %vm249_vm4 = vcmask 261120  }
  0x37   : > { %v864_v6 = vld [vmem:[%s166_s11 + $0x18] sm:$0xff]  ;;  %v203_v7 = vadd.f32 %v860_v4, %v856_v2  ;;  %v868_v8 = vld [vmem:[%s166_s11 + $0x30] sm:$0xff]  ;;  %v214_v15 = vld [vmem:[%s951_s1 + $0x8] sm:$0xff]  ;;  %559 = vmatprep.mubr.msk.f32.mxu0 %vm721_vm0, %v720_v12  ;;  %564 = vmatprep.mubr.msk.f32.mxu1 %vm721_vm0, %v720_v12  ;;  %v223_v18 = vand.u32 127, %v222_v17  ;;  %v225_v19 = vshrl.u32 %v222_v17, 7  ;;  %vm323_vm5 = vcmask 64512  }
  0x38   : > { %v870_v9 = vld [vmem:[%s166_s11 + $0x38] sm:$0xff]  ;;  %198 = vadd.xlane.f32.xlu0 %v197_v3  ;;  %v200_v10 = vadd.f32 %v864_v6, %v862_v5  ;;  %v215_v14 = vld [vmem:[%s951_s1 + $0x10] sm:$0xff]  ;;  %v213_v16 = vld [vmem:[%s951_s1] sm:$0xff]  ;;  %s188_s27 = scalar_lea.vmem [#allocation5], %s532_s9  ;;  %s543_s29 = sshll.u32 %s766_s16, 10 }
  0x39   : > { %204 = vadd.xlane.f32.xlu1 %v203_v7  ;;  %v206_v11 = vadd.f32 %v870_v9, %v868_v8  ;;  %v216_v13 = vld [vmem:[%s951_s1 + $0x18] sm:$0xff]  ;;  %v228_v20 = vadd.s32 4294967288, %v223_v18  ;;  %v235_v22 = vadd.s32 4294967280, %v223_v18  ;;  %v242_v23 = vadd.s32 4294967272, %v223_v18  ;;  %v217_v42 = vld [vmem:[%s952_s2] sm:$0xff]  ;;  %s452_s28 = sshll.u32 %s188_s27, 4  ;;  %s905_s10 = scalar_lea.hbm %s953_s3, %s543_s29  ;;  %s900_s28 = int_to_ptr.vmem [resolvable:$true] %s452_s28 }
  0x3a   : > { %552 = vmatpush3.msra.mxu0 %v216_v13  ;;  %v226_v25 = vsub.s32 %v223_v18, %v225_v19  ;;  %563 = vmatpush3.msra.mxu1 %v217_v42  ;;  %v405_v51 = vsub.s32 0, %v225_v19  ;;  %s439_s16 = scalar_lea.sflag [#allocation4], %s842_s5  ;;  %s651_s11 = scalar_lea.vmem %s900_s28, 1024 }
  0x3b   : > { %553 = vmatprep.subr.mxu0 %v720_v12  ;;  %v231_v27 = vsub.s32 %v228_v20, %v225_v19  ;;  %v238_v28 = vsub.s32 %v235_v22, %v225_v19  ;;  %v245_v31 = vsub.s32 %v242_v23, %v225_v19  ;;  %p652_p11 = scmp.ne.s32.totalorder %s900_s28, %s651_s11  ;;  %p962_p12 = scmp.ne.s32.totalorder %s958_s24, 0 }
  0x3c   : > { %201 = vadd.xlane.f32.xlu0 %v200_v10  ;;  %554 = vmatpush3.msra.mxu0 %v215_v14  ;;  %s722_s23 = smov [#allocation5]  }
  0x3d   : > { %207 = vadd.xlane.f32.xlu1 %v206_v11  ;;  %555 = vmatprep.subr.mxu0 %v720_v12  ;;  %p653_p13 = pnand %p652_p11, %p962_p12  ;;  %s655_s4 = sshll.u32 %s722_s23, 4  ;;  %s656_s4 = int_to_ptr.vmem [resolvable:$false] %s655_s4 }
  0x3e   : > { %556 = vmatpush3.msra.mxu0 %v214_v15  ;;  %s657_s6 = scalar_lea.vmem %s656_s4, 2048  ;;  %p658_p5 = scmp.lt.s32.totalorder %s900_s28, %s656_s4 }
  0x3f   : > { %557 = vmatprep.subr.mxu0 %v720_v12  ;;  %p654_p4 = pneg %p653_p13  ;;  %p659_p7 = scmp.lt.s32.totalorder %s657_s6, %s651_s11 }
  0x40   : > { %558 = vmatpush3.msra.mxu0 %v213_v16 }
  0x41   : > { %p660_p8 = por %p659_p7, %p658_p5 }
  0x43   : > { %p661_p10 = pnand %p660_p8, %p654_p4 }
  0xc1   : > { %v199_v21 = vpop.xlane.xlu0 %198 }
  0xc2   : > { %v205_v24 = vpop.xlane.xlu1 %204  ;;  %v209_v26 = vmul.f32 0.00390625, %v199_v21 }
  0xc3   : > { %v211_v29 = vmul.f32 0.00390625, %v205_v24 }
  0xc4   : > { %v227_v35 = vrot.slane %v209_v26, %v226_v25 }
  0xc5   : > { %v202_v30 = vpop.xlane.xlu0 %201  ;;  %v239_v37 = vrot.slane %v211_v29, %v238_v28 }
  0xc6   : > { %v210_v32 = vmul.f32 0.00390625, %v202_v30  ;;  %v208_v33 = vpop.xlane.xlu1 %207 }
  0xc7   : > { %v212_v34 = vmul.f32 0.00390625, %v208_v33 }
  0xc8   : > { %v232_v36 = vrot.slane %v210_v32, %v231_v27 }
  0xc9   : > { %v246_v38 = vrot.slane %v212_v34, %v245_v31 }
  0xca   : > { %v234_v39 = vsel %vm233_vm1, %v232_v36, %v227_v35 }
  0xcb   : > { %v241_v40 = vsel %vm240_vm2, %v239_v37, %v234_v39 }
  0xcc   : > { %v248_v41 = vsel %vm247_vm3, %v246_v38, %v241_v40 }
  0xcd   : > { %560 = vmatmul.mubr.msk.f32.vlgmr.msra.gmra.mxu0 %vm249_vm4, %v248_v41 }
 0x18d   : > { %v318_v43 = vpop.f32.mrf.mxu0 }
 0x18e   : > { %v322_v44 = vmax.f32 %v318_v43, 0.0 }
 0x18f   : > { %v561_v45 = vpop.f32.mrf.mxu0 }
 0x190   : > { %565 = vmatmul.mubr.msk.f32.vlgmr.msra.gmra.mxu1 %vm323_vm5, %v322_v44 }
 0x250   : > { %v393_v46 = vpop.f32.mrf.mxu1 }
 0x251   : > { %v536_v47 = vmul.f32 -1.442695, %v393_v46 }
 0x252   : > { %v566_v48 = vpop.f32.mrf.mxu1 }
 0x253   : > { %619 = vpow2.f32 %v536_v47 }
 0x260   : > { %v620_v49 = vpop.eup %619 }
 0x261   : > { %v400_v50 = vadd.f32 1.0, %v620_v49 }
 0x263   : > { %621 = vrcp.f32 %v400_v50 }
 0x270   : > { %v622_v52 = vpop.eup %621 }
 0x271   : > { %v406_v53 = vrot.slane %v622_v52, %v405_v51 }
 0x273   : > { %412 = vbcast.lane.b32.xlu1 %v406_v53, 264  ;;  %408 = vbcast.lane.b32.xlu0 %v406_v53, 256 }
 0x277   : > { %416 = vbcast.lane.b32.xlu1 %v406_v53, 272 }
 0x27b   : > { %420 = vbcast.lane.b32.xlu1 %v406_v53, 280 }
 0x2e5   : > { %v413_v54 = vpop.permute.xlu1 %412  ;;  %v409_v55 = vpop.permute.xlu0 %408 }
 0x2e6   : > { %v424_v56 = vmul.f32 %v413_v54, %v862_v5  ;;  %v425_v57 = vmul.f32 %v413_v54, %v864_v6  ;;  %v422_v58 = vmul.f32 %v409_v55, %v852_v0  ;;  %v423_v59 = vmul.f32 %v409_v55, %v854_v1 }
 0x2e8   : > { %432 = vst [vmem:[%s188_s27 + $0x10] sm:$0xff] %v424_v56  ;;  %433 = vst [vmem:[%s188_s27 + $0x18] sm:$0xff] %v425_v57 }
 0x2e9   : > { %430 = vst [vmem:[%s188_s27] sm:$0xff] %v422_v58  ;;  %431 = vst [vmem:[%s188_s27 + $0x8] sm:$0xff] %v423_v59  ;;  %v417_v60 = vpop.permute.xlu1 %416 }
 0x2ea   : > { %v426_v61 = vmul.f32 %v417_v60, %v856_v2  ;;  %v427_v62 = vmul.f32 %v417_v60, %v860_v4 }
 0x2ec   : > { %434 = vst [vmem:[%s188_s27 + $0x20] sm:$0xff] %v426_v61  ;;  %435 = vst [vmem:[%s188_s27 + $0x28] sm:$0xff] %v427_v62 }
 0x2ed   : > { %v421_v63 = vpop.permute.xlu1 %420 }
 0x2ee   : > { %v428_v0 = vmul.f32 %v421_v63, %v868_v8  ;;  %v429_v1 = vmul.f32 %v421_v63, %v870_v9 }
 0x2f0   : > { %436 = vst [vmem:[%s188_s27 + $0x30] sm:$0xff] %v428_v0  ;;  %437 = vst [vmem:[%s188_s27 + $0x38] sm:$0xff] %v429_v1 }
 0x2f1   : > { %664 = shalt.err (!%p661_p10)
}
 0x2f2   : > { %s665_s7 = scalar_lea.hbm %s905_s10, 1024  ;;  %s669_s19 = scalar_lea.hbm %s953_s3, 2048 }
 0x2f3   : > { %p666_p0 = scmp.ne.s32.totalorder %s905_s10, %s665_s7  ;;  %p670_p1 = scmp.lt.s32.totalorder %s905_s10, %s953_s3 }
 0x2f4   : > { %p671_p3 = scmp.lt.s32.totalorder %s669_s19, %s665_s7 }
 0x2f5   : > { %p667_p2 = pnand %p666_p0, %p962_p12 }
 0x2f6   : > { %p672_p6 = por %p671_p3, %p670_p1 }
 0x2f7   : > { %p668_p9 = pneg %p667_p2 }
 0x2f9   : > { %p673_p11 = pnand %p672_p6, %p668_p9 }
 0x2fb   : > { %676 = shalt.err (!%p673_p11)
}
 0x2fc   : > { %s723_s26 = smov 256   ;;  %s724_s27 = smov 16  }
 0x2fd   : > { %569 = dma.vmem_to_hbm [thread:$0]  (%p962_p12), %s900_s28, 1024, %s905_s10, %s439_s16, %s723_s26, %s723_s26, %s724_s27  }
 0x2fe PF: > { %s467_s29 = sand.u32 1, %s703_s12   ;;  %p963_p13 = scmp.ne.s32.totalorder %s959_s25, 0 }
 0x2ff   : > { %p964_p4 = scmp.ge.s32.totalorder %s715_s15, 2  ;;  %s468_s30 = scalar_lea.sflag [#allocation4], %s467_s29 }
 0x301   : > { %p576_p5 = pnand %p964_p4, %p963_p13 }
 0x303   : > { %p577_p7 = pneg %p576_p5 }
 0x305   : > { %698 = dma.done.wait (%p577_p7), %s468_s30, 1024  }
 0x306   : > { %700 = vsyncadd (%p577_p7), %s468_s30, 4294966272  ;;  %p16_p8 = scmp.ge.s32.totalorder %s770_s18, 4   ;;  %s965_s12 = smov %s707_s13 }
 0x307   : > { %s966_s13 = smov %s711_s14  ;;  %s967_s14 = smov %s782_s21 }
 0x308   : > { %s968_s15 = smov %s770_s18  ;;  %18 = sbr.rel (!%p16_p8) target bundleno = 5 (0x5), region = 77 }
 0x30d   :  { %473 = vsyncpa [#allocation3], 1 }
 0x30e   :  { %475 = vsyncpa [#allocation3 + $0x1], 1 }
 0x30f   :  { %476 = vsyncpa [#allocation4], 1 }
 0x310   :  { %478 = vsyncpa [#allocation4 + $0x1], 1 }

</bundles_post_ra>
